<compile_context>
chip_gen: v7x
topology: tpu7x:2x2x1
jax: 0.10.0
libtpu: 0.0.40
codegen_flags: <defaults>
</compile_context>

<pallas_src>
import jax
import jax.numpy as jnp
from jax.experimental import pallas as pl
from jax.experimental.pallas import tpu as pltpu


def annwine_kernel(x_ref,
                   w0_ref, b0_ref,
                   w1_ref, b1_ref,
                   w2_ref, b2_ref,
                   w3_ref, b3_ref,
                   o_ref):
    # x_ref: (TB, 10) batch-major tile, straight from HBM (no wrapper transpose).
    x = x_ref[...].astype(jnp.float32)

    # Layer 1: Linear(10, 16) + ReLU.  Contract x's feature axis against W0's
    # in-features axis (trans-rhs matmul) -> (16, TB): batch moves onto the
    # lane axis and stays there for the rest of the network.
    h = jax.lax.dot_general(w0_ref[...], x, (((1,), (1,)), ((), ())),
                            preferred_element_type=jnp.float32)
    h = jnp.maximum(h + b0_ref[...], 0.0)

    # Layer 2: Linear(16, 32) + ReLU -> (32, TB)
    h = jnp.dot(w1_ref[...], h, preferred_element_type=jnp.float32)
    h = jnp.maximum(h + b1_ref[...], 0.0)

    # Layer 3: Linear(32, 32) + ReLU -> (32, TB)
    h = jnp.dot(w2_ref[...], h, preferred_element_type=jnp.float32)
    h = jnp.maximum(h + b2_ref[...], 0.0)

    # Output: Linear(32, 1), no activation -> (1, TB), lane-dense store.
    y = jnp.dot(w3_ref[...], h, preferred_element_type=jnp.float32)
    o_ref[...] = (y + b3_ref[...]).astype(o_ref.dtype)


def annwine_forward(x, params, *, tb=32768, input_dtype=None):
    """x: (B, 10). params: PyTorch-layout [(W (out,in), b (out,)), ...].

    input_dtype=jnp.bfloat16 halves HBM traffic of the only large operand
    (the kernel is input-bandwidth bound); default keeps f32 inputs.
    """
    (w0, b0), (w1, b1), (w2, b2), (w3, b3) = params
    B = x.shape[0]
    if input_dtype is not None:
        x = x.astype(input_dtype)

    # Batch tile: multiple of 128 lanes, large enough to amortize per-step
    # pipeline overhead (~1.3 MB of x per step at 32768), but capped so we get
    # >= 2 grid steps when B allows (v7x has two TensorCores to shard over).
    TB = max(128, min(tb, 128 * pl.cdiv(B, 256)))
    grid_b = pl.cdiv(B, TB)

    # Biases as (out, 1) columns: broadcast over the lane (batch) axis.
    b0c, b1c, b2c, b3c = (b.reshape(-1, 1) for b in (b0, b1, b2, b3))

    # Weights / biases: full-array blocks with constant index_maps -> fetched
    # once, VMEM-resident across all batch-grid steps.
    const = lambda a: pl.BlockSpec(a.shape, lambda i: (0,) * a.ndim)

    out = pl.pallas_call(
        annwine_kernel,
        out_shape=jax.ShapeDtypeStruct((1, B), jnp.float32),
        grid=(grid_b,),
        in_specs=[pl.BlockSpec((TB, 10), lambda i: (i, 0)),
                  const(w0), const(b0c),
                  const(w1), const(b1c),
                  const(w2), const(b2c),
                  const(w3), const(b3c)],
        out_specs=pl.BlockSpec((1, TB), lambda i: (0, i)),
        compiler_params=pltpu.CompilerParams(
            dimension_semantics=("parallel",)),
    )(x, w0, b0c, w1, b1c, w2, b2c, w3, b3c)

    # Back to the PyTorch-style (B, 1) output (trivial: one dim is 1).
    return out.T


def init_params(key):
    """Deterministic init mimicking nn.Linear's U(-1/sqrt(in), 1/sqrt(in)).

    Weights are kept in PyTorch's native (out_features, in_features) layout.
    """
    dims = [(10, 16), (16, 32), (32, 32), (32, 1)]
    params = []
    for (fan_in, fan_out) in dims:
        key, kw, kb = jax.random.split(key, 3)
        bound = 1.0 / jnp.sqrt(jnp.float32(fan_in))
        w = jax.random.uniform(kw, (fan_out, fan_in), jnp.float32, -bound, bound)
        b = jax.random.uniform(kb, (fan_out,), jnp.float32, -bound, bound)
        params.append((w, b))
    return params


def reference_forward(x, params):
    (w0, b0), (w1, b1), (w2, b2), (w3, b3) = params
    h = jnp.maximum(x @ w0.T + b0, 0.0)
    h = jnp.maximum(h @ w1.T + b1, 0.0)
    h = jnp.maximum(h @ w2.T + b2, 0.0)
    return h @ w3.T + b3


if __name__ == "__main__":
    key = jax.random.PRNGKey(0)
    key, kx1, kx2 = jax.random.split(key, 3)
    params = init_params(key)

    # Primary small check (single ragged tile, B < 128).
    B = 8
    x = jax.random.normal(kx1, (B, 10), jnp.float32)
    out = jax.block_until_ready(annwine_forward(x, params))
    ref = reference_forward(x, params)
    assert out.shape == (B, 1)
    assert jnp.allclose(out, ref, atol=1e-5, rtol=1e-5), "f32 mismatch (B=8)"

    # Multi-step grid + ragged last tile (exercises TB cap / partial block).
    B2 = 300
    x2 = jax.random.normal(kx2, (B2, 10), jnp.float32)
    out2 = jax.block_until_ready(annwine_forward(x2, params))
    ref2 = reference_forward(x2, params)
    assert out2.shape == (B2, 1)
    assert jnp.allclose(out2, ref2, atol=1e-5, rtol=1e-5), "f32 mismatch (B=300)"

    # Optional bf16-input fast path (halves HBM traffic of x); loose tolerance.
    out_bf16 = jax.block_until_ready(
        annwine_forward(x, params, input_dtype=jnp.bfloat16))
    assert out_bf16.shape == (B, 1)
    assert jnp.allclose(out_bf16, ref, atol=5e-2, rtol=5e-2), "bf16 mismatch"

    print("KERNEL_OK")
</pallas_src>

<mosaic_0001>
module attributes {stable_mosaic.version = 11 : i64} {
  func.func @annwine_kernel(%arg0: i32, %arg1: memref<128x10xf32, #tpu.memory_space<vmem>>, %arg2: memref<16x10xf32, #tpu.memory_space<vmem>>, %arg3: memref<16x1xf32, #tpu.memory_space<vmem>>, %arg4: memref<32x16xf32, #tpu.memory_space<vmem>>, %arg5: memref<32x1xf32, #tpu.memory_space<vmem>>, %arg6: memref<32x32xf32, #tpu.memory_space<vmem>>, %arg7: memref<32x1xf32, #tpu.memory_space<vmem>>, %arg8: memref<1x32xf32, #tpu.memory_space<vmem>>, %arg9: memref<1x1xf32, #tpu.memory_space<vmem>>, %arg10: memref<1x128xf32, #tpu.memory_space<vmem>>) attributes {dimension_semantics = [#tpu.dimension_semantics<parallel>], iteration_bounds = array<i64: 1>, scalar_prefetch = 0 : i64, scratch_operands = 0 : i64, tpu.core_type = #tpu.core_type<tc>, window_params = [{transform_indices = @transform_0, window_bounds = array<i64: 128, 10>}, {pipeline_mode = #tpu.pipeline_mode<synchronous>, transform_indices = @transform_1, window_bounds = array<i64: 16, 10>}, {pipeline_mode = #tpu.pipeline_mode<synchronous>, transform_indices = @transform_2, window_bounds = array<i64: 16, 1>}, {pipeline_mode = #tpu.pipeline_mode<synchronous>, transform_indices = @transform_3, window_bounds = array<i64: 32, 16>}, {pipeline_mode = #tpu.pipeline_mode<synchronous>, transform_indices = @transform_4, window_bounds = array<i64: 32, 1>}, {pipeline_mode = #tpu.pipeline_mode<synchronous>, transform_indices = @transform_5, window_bounds = array<i64: 32, 32>}, {pipeline_mode = #tpu.pipeline_mode<synchronous>, transform_indices = @transform_6, window_bounds = array<i64: 32, 1>}, {pipeline_mode = #tpu.pipeline_mode<synchronous>, transform_indices = @transform_7, window_bounds = array<i64: 1, 32>}, {pipeline_mode = #tpu.pipeline_mode<synchronous>, transform_indices = @transform_8, window_bounds = array<i64: 1, 1>}, {transform_indices = @transform_9, window_bounds = array<i64: 1, 128>}]} {
    %c0 = arith.constant 0 : index
    %c0_0 = arith.constant 0 : index
    %0 = vector.load %arg1[%c0, %c0_0] : memref<128x10xf32, #tpu.memory_space<vmem>>, vector<128x10xf32>
    %c0_1 = arith.constant 0 : index
    %c0_2 = arith.constant 0 : index
    %1 = vector.load %arg2[%c0_1, %c0_2] : memref<16x10xf32, #tpu.memory_space<vmem>>, vector<16x10xf32>
    %cst = arith.constant dense<0.000000e+00> : vector<16x128xf32>
    %2 = tpu.matmul %1, %0, %cst {dimension_numbers = #tpu.dot_dimension_numbers<[1], [1], [0], [0], [0, 0, 1, 0], [], []>} : vector<16x10xf32>, vector<128x10xf32>, vector<16x128xf32> -> vector<16x128xf32>
    %c0_3 = arith.constant 0 : index
    %c0_4 = arith.constant 0 : index
    %3 = vector.load %arg3[%c0_3, %c0_4] : memref<16x1xf32, #tpu.memory_space<vmem>>, vector<16x1xf32>
    %4 = vector.broadcast %3 : vector<16x1xf32> to vector<16x128xf32>
    %5 = arith.addf %2, %4 : vector<16x128xf32>
    %cst_5 = arith.constant 0.000000e+00 : f32
    %6 = vector.broadcast %cst_5 : f32 to vector<16x128xf32>
    %7 = arith.maximumf %5, %6 : vector<16x128xf32>
    %c0_6 = arith.constant 0 : index
    %c0_7 = arith.constant 0 : index
    %8 = vector.load %arg4[%c0_6, %c0_7] : memref<32x16xf32, #tpu.memory_space<vmem>>, vector<32x16xf32>
    %cst_8 = arith.constant dense<0.000000e+00> : vector<32x128xf32>
    %9 = tpu.matmul %8, %7, %cst_8 {dimension_numbers = #tpu.dot_dimension_numbers<[1], [0], [0], [1], [0, 0, 1, 1], [], []>} : vector<32x16xf32>, vector<16x128xf32>, vector<32x128xf32> -> vector<32x128xf32>
    %c0_9 = arith.constant 0 : index
    %c0_10 = arith.constant 0 : index
    %10 = vector.load %arg5[%c0_9, %c0_10] : memref<32x1xf32, #tpu.memory_space<vmem>>, vector<32x1xf32>
    %11 = vector.broadcast %10 : vector<32x1xf32> to vector<32x128xf32>
    %12 = arith.addf %9, %11 : vector<32x128xf32>
    %cst_11 = arith.constant 0.000000e+00 : f32
    %13 = vector.broadcast %cst_11 : f32 to vector<32x128xf32>
    %14 = arith.maximumf %12, %13 : vector<32x128xf32>
    %c0_12 = arith.constant 0 : index
    %c0_13 = arith.constant 0 : index
    %15 = vector.load %arg6[%c0_12, %c0_13] : memref<32x32xf32, #tpu.memory_space<vmem>>, vector<32x32xf32>
    %cst_14 = arith.constant dense<0.000000e+00> : vector<32x128xf32>
    %16 = tpu.matmul %15, %14, %cst_14 {dimension_numbers = #tpu.dot_dimension_numbers<[1], [0], [0], [1], [0, 0, 1, 1], [], []>} : vector<32x32xf32>, vector<32x128xf32>, vector<32x128xf32> -> vector<32x128xf32>
    %c0_15 = arith.constant 0 : index
    %c0_16 = arith.constant 0 : index
    %17 = vector.load %arg7[%c0_15, %c0_16] : memref<32x1xf32, #tpu.memory_space<vmem>>, vector<32x1xf32>
    %18 = vector.broadcast %17 : vector<32x1xf32> to vector<32x128xf32>
    %19 = arith.addf %16, %18 : vector<32x128xf32>
    %cst_17 = arith.constant 0.000000e+00 : f32
    %20 = vector.broadcast %cst_17 : f32 to vector<32x128xf32>
    %21 = arith.maximumf %19, %20 : vector<32x128xf32>
    %c0_18 = arith.constant 0 : index
    %c0_19 = arith.constant 0 : index
    %22 = vector.load %arg8[%c0_18, %c0_19] : memref<1x32xf32, #tpu.memory_space<vmem>>, vector<1x32xf32>
    %cst_20 = arith.constant dense<0.000000e+00> : vector<1x128xf32>
    %23 = tpu.matmul %22, %21, %cst_20 {dimension_numbers = #tpu.dot_dimension_numbers<[1], [0], [0], [1], [0, 0, 1, 1], [], []>} : vector<1x32xf32>, vector<32x128xf32>, vector<1x128xf32> -> vector<1x128xf32>
    %c0_21 = arith.constant 0 : index
    %c0_22 = arith.constant 0 : index
    %24 = vector.load %arg9[%c0_21, %c0_22] : memref<1x1xf32, #tpu.memory_space<vmem>>, vector<1x1xf32>
    %25 = vector.broadcast %24 : vector<1x1xf32> to vector<1x128xf32>
    %26 = arith.addf %23, %25 : vector<1x128xf32>
    %c0_23 = arith.constant 0 : index
    %c0_24 = arith.constant 0 : index
    %27 = vector.load %arg10[%c0_23, %c0_24] : memref<1x128xf32, #tpu.memory_space<vmem>>, vector<1x128xf32>
    tpu.vector_store %arg10[%c0_23, %c0_24], %26 {strides = array<i32>} : memref<1x128xf32, #tpu.memory_space<vmem>>, vector<1x128xf32>,
    return
  }
  func.func @transform_0(%arg0: i32) -> (i32, i32) {
    %c0_i32 = arith.constant 0 : i32
    %c0_i32_0 = arith.constant 0 : i32
    return %arg0, %c0_i32 : i32, i32
  }
  func.func @transform_1(%arg0: i32) -> (i32, i32) {
    %c0_i32 = arith.constant 0 : i32
    %c0_i32_0 = arith.constant 0 : i32
    %c0_i32_1 = arith.constant 0 : i32
    return %c0_i32, %c0_i32_0 : i32, i32
  }
  func.func @transform_2(%arg0: i32) -> (i32, i32) {
    %c0_i32 = arith.constant 0 : i32
    %c0_i32_0 = arith.constant 0 : i32
    %c0_i32_1 = arith.constant 0 : i32
    return %c0_i32, %c0_i32_0 : i32, i32
  }
  func.func @transform_3(%arg0: i32) -> (i32, i32) {
    %c0_i32 = arith.constant 0 : i32
    %c0_i32_0 = arith.constant 0 : i32
    %c0_i32_1 = arith.constant 0 : i32
    return %c0_i32, %c0_i32_0 : i32, i32
  }
  func.func @transform_4(%arg0: i32) -> (i32, i32) {
    %c0_i32 = arith.constant 0 : i32
    %c0_i32_0 = arith.constant 0 : i32
    %c0_i32_1 = arith.constant 0 : i32
    return %c0_i32, %c0_i32_0 : i32, i32
  }
  func.func @transform_5(%arg0: i32) -> (i32, i32) {
    %c0_i32 = arith.constant 0 : i32
    %c0_i32_0 = arith.constant 0 : i32
    %c0_i32_1 = arith.constant 0 : i32
    return %c0_i32, %c0_i32_0 : i32, i32
  }
  func.func @transform_6(%arg0: i32) -> (i32, i32) {
    %c0_i32 = arith.constant 0 : i32
    %c0_i32_0 = arith.constant 0 : i32
    %c0_i32_1 = arith.constant 0 : i32
    return %c0_i32, %c0_i32_0 : i32, i32
  }
  func.func @transform_7(%arg0: i32) -> (i32, i32) {
    %c0_i32 = arith.constant 0 : i32
    %c0_i32_0 = arith.constant 0 : i32
    %c0_i32_1 = arith.constant 0 : i32
    return %c0_i32, %c0_i32_0 : i32, i32
  }
  func.func @transform_8(%arg0: i32) -> (i32, i32) {
    %c0_i32 = arith.constant 0 : i32
    %c0_i32_0 = arith.constant 0 : i32
    %c0_i32_1 = arith.constant 0 : i32
    return %c0_i32, %c0_i32_0 : i32, i32
  }
  func.func @transform_9(%arg0: i32) -> (i32, i32) {
    %c0_i32 = arith.constant 0 : i32
    %c0_i32_0 = arith.constant 0 : i32
    return %c0_i32, %arg0 : i32, i32
  }
}

</mosaic_0001>

<bundles_post_ra>
// kernel: tpu_custom_call.1
= control target key start
LH: loop header
LB: loop body
LE: loop exit
PB: predicated region body
PF: predicated region fallthrough
CT: control target
= control target key end

     0   :  { %s1017_s0 = inlined_call_operand.vmem [shape: f32[8,10], index: 0, kind: input, shape index: {}]   ;;  %s1018_s1 = inlined_call_operand.vmem [shape: f32[16,10], index: 1, kind: input, shape index: {}]   ;;  %s1019_s2 = inlined_call_operand.vmem [shape: f32[16,1], index: 2, kind: input, shape index: {}]   ;;  %s1020_s3 = inlined_call_operand.vmem [shape: f32[32,16], index: 3, kind: input, shape index: {}]   ;;  %s1021_s4 = inlined_call_operand.vmem [shape: f32[32,1], index: 4, kind: input, shape index: {}]   ;;  %s1022_s5 = inlined_call_operand.vmem [shape: f32[32,32], index: 5, kind: input, shape index: {}]   ;;  %s1023_s6 = inlined_call_operand.vmem [shape: f32[32,1], index: 6, kind: input, shape index: {}]   ;;  %s1024_s7 = inlined_call_operand.vmem [shape: f32[1,32], index: 7, kind: input, shape index: {}]   ;;  %s1025_s8 = inlined_call_operand.<no memory space> [shape: f32[1,1], index: 8, kind: input, shape index: {}]   ;;  %s1026_s9 = inlined_call_operand.hbm [shape: f32[1,8], index: 9, kind: output, shape index: {}]  }
   0x1   :  { %v14_v0 = vstv %s1025_s8 }
   0x2   :  { %15 = vst [vmem:[#allocation2] sm:$0x1] %v14_v0 }
   0x3   :  { %v35_v1 = vld [vmem:[%s1017_s0] sm:$0xff]  ;;  %v36_v2 = vld [vmem:[%s1017_s0 + $0x8] sm:$0xff]  ;;  %vm65_vm0 = vcmask 80896   ;;  %v37_v3 = vld [vmem:[%s1017_s0 + $0x10] sm:$0xff]  ;;  %v787_v7 = vmov 0  }
   0x4   :  { %v690_v4 = vpack.c.bf16 %v36_v2, %v35_v1  ;;  %vm856_vm1 = vmpackc.low %vm65_vm0, %vm65_vm0  ;;  %v38_v6 = vld [vmem:[%s1017_s0 + $0x18] sm:$0xff]  ;;  %761 = vset.pattern.permute.xlu0 %v787_v7  ;;  %762 = vset.pattern.permute.xlu1 %v787_v7  ;;  %v51_v9 = vld [vmem:[%s1018_s1] sm:$0xff] }
   0x5   :  { %v696_v8 = vpack.c.bf16 %v38_v6, %v37_v3  ;;  %v39_v10 = vld [vmem:[%s1017_s0 + $0x20] sm:$0xff]  ;;  %v40_v11 = vld [vmem:[%s1017_s0 + $0x28] sm:$0xff]  ;;  %652 = vmatprep.mubr.msk.f32.mxu0 %vm65_vm0, %v51_v9 }
   0x6   :  { %692 = vmatprep.subr.msk.bf16.mxu0 %vm856_vm1, %v690_v4  ;;  %v53_v12 = vld [vmem:[%s1019_s2] sm:$0xff]  ;;  %v54_v13 = vld [vmem:[%s1019_s2 + $0x8] sm:$0xff] }
   0x7   :  { %695 = vmatpush3.bf16.xpose.msk.msra.mxu0 %vm856_vm1, %v690_v4  ;;  %57 = vperm.xlu0 %761, %v53_v12  }
   0x8   :  { %698 = vmatprep.subr.msk.bf16.mxu0 %vm856_vm1, %v696_v8 }
   0x9   :  { %16 = vsyncpa [#allocation4], 0  ;;  %v702_v14 = vpack.c.bf16 %v40_v11, %v39_v10  ;;  %v203_v15 = vld [vmem:[%s1021_s4 + $0x10] sm:$0xff]  ;;  %v42_v17 = vld [vmem:[%s1017_s0 + $0x38] sm:$0xff]  ;;  %vm225_vm2 = vcmask 130048   ;;  %vm355_vm3 = vcmask 261120  }
   0xa   :  { %v41_v16 = vld [vmem:[%s1017_s0 + $0x30] sm:$0xff]  ;;  %v331_v18 = vld [vmem:[%s1023_s6] sm:$0xff]  ;;  %v44_v22 = vld [vmem:[%s1017_s0 + $0x48] sm:$0xff]  ;;  %v788_v11 = vmov 0.0|0.0   ;;  %vm789_vm4 = vmmov 0   ;;  %v790_v12 = vmov 0.0  }
   0xb   :  { %62 = vperm.xlu0 %761, %v54_v13   ;;  %v708_v19 = vpack.c.bf16 %v42_v17, %v41_v16  ;;  %v333_v20 = vld [vmem:[%s1023_s6 + $0x10] sm:$0xff]  ;;  %v43_v21 = vld [vmem:[%s1017_s0 + $0x40] sm:$0xff]  ;;  %v46_v26 = vld [vmem:[%s1017_s0 + $0x58] sm:$0xff]  ;;  %s791_s11 = smov [#allocation3]  }
   0xc   :  { %v458_v23 = vld [vmem:[#allocation2] sm:$0x1]  ;;  %v714_v24 = vpack.c.bf16 %v44_v22, %v43_v21  ;;  %v45_v25 = vld [vmem:[%s1017_s0 + $0x50] sm:$0xff]  ;;  %v48_v29 = vld [vmem:[%s1017_s0 + $0x68] sm:$0xff]  ;;  %s548_s12 = sshll.u32 %s791_s11, 4  ;;  %s549_s12 = int_to_ptr.vmem [resolvable:$true] %s548_s12 }
   0xd   :  { %v720_v27 = vpack.c.bf16 %v46_v26, %v45_v25  ;;  %v47_v28 = vld [vmem:[%s1017_s0 + $0x60] sm:$0xff]  ;;  %v49_v31 = vld [vmem:[%s1017_s0 + $0x70] sm:$0xff]  ;;  %v50_v32 = vld [vmem:[%s1017_s0 + $0x78] sm:$0xff]  ;;  %s763_s2 = scalar_lea.vmem %s549_s12, 16  ;;  %s767_s0 = scalar_lea.vmem %s549_s12, 32 }
   0xe   :  { %v726_v30 = vpack.c.bf16 %v48_v29, %v47_v28  ;;  %v732_v33 = vpack.c.bf16 %v50_v32, %v49_v31  ;;  %v52_v34 = vld [vmem:[%s1018_s1 + $0x8] sm:$0xff]  ;;  %v197_v35 = vld [vmem:[%s1020_s3] sm:$0xff]  ;;  %v204_v38 = vld [vmem:[%s1021_s4 + $0x18] sm:$0xff]  ;;  %v464_v32 = vlaneseq  ;;  %p764_p0 = scmp.ne.s32.totalorder %s549_s12, %s763_s2  ;;  %p768_p1 = scmp.lt.s32.totalorder %s549_s12, %s549_s12 }
   0xf   :  { %701 = vmatpush3.bf16.xpose.msk.msra.mxu0 %vm856_vm1, %v696_v8  ;;  %217 = vperm.xlu0 %761, %v203_v15   ;;  %v201_v36 = vld [vmem:[%s1021_s4] sm:$0xff]  ;;  %v202_v37 = vld [vmem:[%s1021_s4 + $0x8] sm:$0xff]  ;;  %v334_v40 = vld [vmem:[%s1023_s6 + $0x18] sm:$0xff]  ;;  %p769_p2 = scmp.lt.s32.totalorder %s767_s0, %s763_s2 }
  0x10   :  { %704 = vmatprep.subr.msk.bf16.mxu0 %vm856_vm1, %v702_v14  ;;  %659 = vmatprep.mubr.msk.f32.mxu1 %vm225_vm2, %v197_v35  ;;  %v332_v39 = vld [vmem:[%s1023_s6 + $0x8] sm:$0xff]  ;;  %v199_v51 = vld [vmem:[%s1020_s3 + $0x10] sm:$0xff]  ;;  %v200_v52 = vld [vmem:[%s1020_s3 + $0x18] sm:$0xff] }
  0x11   :  { %207 = vperm.xlu1 %762, %v201_v36   ;;  %v198_v50 = vld [vmem:[%s1020_s3 + $0x8] sm:$0xff]  ;;  %v327_v53 = vld [vmem:[%s1022_s5] sm:$0xff]  ;;  %v329_v9 = vld [vmem:[%s1022_s5 + $0x10] sm:$0xff]  ;;  %p770_p3 = por %p769_p2, %p768_p1 }
  0x12   :  { %v328_v8 = vld [vmem:[%s1022_s5 + $0x8] sm:$0xff]  ;;  %v330_v10 = vld [vmem:[%s1022_s5 + $0x18] sm:$0xff]  ;;  %v457_v31 = vld [vmem:[%s1024_s7] sm:$0x1] }
  0x13   :  { %337 = vperm.xlu0 %761, %v331_v18   ;;  %p771_p4 = pnand %p770_p3, %p764_p0 }
  0x15   :  { %212 = vperm.xlu1 %762, %v202_v37  }
  0x17   :  { %707 = vmatpush3.bf16.xpose.msk.msra.mxu0 %vm856_vm1, %v702_v14  ;;  %347 = vperm.xlu0 %761, %v333_v20  }
  0x18   :  { %710 = vmatprep.subr.msk.bf16.mxu0 %vm856_vm1, %v708_v19 }
  0x19   :  { %222 = vperm.xlu1 %762, %v204_v38  }
  0x1b   :  { %461 = vperm.xlu0 %761, %v458_v23  }
  0x1d   :  { %342 = vperm.xlu1 %762, %v332_v39  }
  0x1f   :  { %713 = vmatpush3.bf16.xpose.msk.msra.mxu0 %vm856_vm1, %v708_v19 }
  0x20   :  { %716 = vmatprep.subr.msk.bf16.mxu0 %vm856_vm1, %v714_v24 }
  0x21   :  { %352 = vperm.xlu1 %762, %v334_v40  }
  0x27   :  { %719 = vmatpush3.bf16.xpose.msk.msra.mxu0 %vm856_vm1, %v714_v24 }
  0x28   :  { %722 = vmatprep.subr.msk.bf16.mxu0 %vm856_vm1, %v720_v27 }
  0x2f   :  { %725 = vmatpush3.bf16.xpose.msk.msra.mxu0 %vm856_vm1, %v720_v27 }
  0x30   :  { %728 = vmatprep.subr.msk.bf16.mxu0 %vm856_vm1, %v726_v30 }
  0x37   :  { %731 = vmatpush3.bf16.xpose.msk.msra.mxu0 %vm856_vm1, %v726_v30 }
  0x38   :  { %734 = vmatprep.subr.msk.bf16.mxu0 %vm856_vm1, %v732_v33 }
  0x3f   :  { %737 = vmatpush3.bf16.xpose.msk.msra.mxu0 %vm856_vm1, %v732_v33  ;;  %v465_v33 = vshrl.u32 %v464_v32, 7 }
  0x46   :  { %653 = vmatmul.mubr.msk.f32.vlgmr.msra.gmra.mrb[0].mxu0 %vm65_vm0, %v52_v34  ;;  %v466_v34 = vsub.s32 0, %v465_v33 }
  0x86   :  { %v58_v41 = vpop.permute.xlu0 %57 }
  0x8a   :  { %v63_v42 = vpop.permute.xlu0 %62 }
  0x8e   :  { %v218_v0 = vpop.permute.xlu0 %217 }
  0x90   :  { %v208_v54 = vpop.permute.xlu1 %207 }
  0x92   :  { %v338_v14 = vpop.permute.xlu0 %337 }
  0x94   :  { %v213_v55 = vpop.permute.xlu1 %212 }
  0x96   :  { %v348_v23 = vpop.permute.xlu0 %347 }
  0x98   :  { %v223_v61 = vpop.permute.xlu1 %222 }
  0x9a   :  { %v462_v35 = vpop.permute.xlu0 %461 }
  0x9b   :  { %v467_v36 = vrot.slane %v462_v35, %v466_v34 }
  0x9c   :  { %v343_v13 = vpop.permute.xlu1 %342 }
  0xa0   :  { %v353_v20 = vpop.permute.xlu1 %352 }
 0x119   :  { %v654_v43 = vpop.f32.mrb[0].mxu0 }
 0x11a   :  { %v192_v44 = vadd.f32 %v654_v43, %v63_v42  ;;  %v186_v45 = vpop.f32.mrb[1].mxu0 }
 0x11b   :  { %v187_v46 = vadd.f32 %v186_v45, %v58_v41 }
 0x11c   :  { %v196_v47 = vmax.f32 %v192_v44, 0.0 }
 0x11d   :  { %v195_v48 = vmax.f32 %v187_v46, 0.0 }
 0x11f   :  { %v738_v49 = vpack.c.bf16 %v196_v47, %v195_v48 }
 0x121   :  { %739 = vmatprep.subr.bf16.mxu1 %v738_v49 }
 0x122   :  { %741 = vmatpush3.bf16.msra.mxu1 %v738_v49 }
 0x125   :  { %660 = vmatmul.mubr.msk.f32.vlgmr.msra.gmra.mrb[0].mxu1 %vm225_vm2, %v198_v50 }
 0x126   :  { %662 = vmatprep.mubr.msk.f32.mxu1 %vm225_vm2, %v199_v51 }
 0x129   :  { %663 = vmatmul.mubr.msk.f32.gmra.mrb[2].mxu1 %vm225_vm2, %v200_v52 }
 0x12a   :  { %673 = vmatprep.mubr.msk.f32.mxu1 %vm355_vm3, %v327_v53 }
 0x1f8   :  { %v661_v56 = vpop.f32.mrb[0].mxu1 }
 0x1f9   :  { %v310_v57 = vadd.f32 %v661_v56, %v213_v55  ;;  %v304_v58 = vpop.f32.mrb[1].mxu1 }
 0x1fa   :  { %v305_v59 = vadd.f32 %v304_v58, %v208_v54 }
 0x1fb   :  { %v324_v60 = vmax.f32 %v310_v57, 0.0 }
 0x1fc   :  { %v323_v62 = vmax.f32 %v305_v59, 0.0  ;;  %v664_v63 = vpop.f32.mrb[2].mxu1 }
 0x1fd   :  { %v320_v1 = vadd.f32 %v664_v63, %v223_v61  ;;  %v314_v2 = vpop.f32.mrb[3].mxu1 }
 0x1fe   :  { %v742_v3 = vpack.c.bf16 %v324_v60, %v323_v62  ;;  %v315_v4 = vadd.f32 %v314_v2, %v218_v0 }
 0x1ff   :  { %v326_v5 = vmax.f32 %v320_v1, 0.0 }
 0x200   :  { %v325_v6 = vmax.f32 %v315_v4, 0.0  ;;  %743 = vmatprep.subr.bf16.mxu1 %v742_v3 }
 0x201   :  { %745 = vmatpush3.bf16.msra.mxu1 %v742_v3 }
 0x202   :  { %v746_v7 = vpack.c.bf16 %v326_v5, %v325_v6 }
 0x204   :  { %747 = vmatprep.subr.bf16.mxu1 %v746_v7 }
 0x205   :  { %749 = vmatpush3.bf16.msra.mxu1 %v746_v7 }
 0x206   :  { %750 = vmatprep.subr.bf16.mxu1 %v788_v11 }
 0x208   :  { %674 = vmatmul.mubr.msk.f32.vlgmr.msra.gmra.mrb[4].mxu1 %vm355_vm3, %v328_v8 }
 0x209   :  { %676 = vmatprep.mubr.msk.f32.mxu1 %vm355_vm3, %v329_v9 }
 0x20c   :  { %677 = vmatmul.mubr.msk.f32.gmra.mrb[6].mxu1 %vm355_vm3, %v330_v10 }
 0x20d   :  { %687 = vmatprep.mubr.msk.f32.mxu1 %vm789_vm4, %v790_v12 }
 0x2db   :  { %v675_v15 = vpop.f32.mrb[4].mxu1 }
 0x2dc   :  { %v440_v16 = vadd.f32 %v675_v15, %v343_v13  ;;  %v434_v17 = vpop.f32.mrb[5].mxu1 }
 0x2dd   :  { %v435_v18 = vadd.f32 %v434_v17, %v338_v14 }
 0x2de   :  { %v454_v19 = vmax.f32 %v440_v16, 0.0 }
 0x2df   :  { %v453_v21 = vmax.f32 %v435_v18, 0.0  ;;  %v678_v22 = vpop.f32.mrb[6].mxu1 }
 0x2e0   :  { %v450_v24 = vadd.f32 %v678_v22, %v353_v20  ;;  %v444_v25 = vpop.f32.mrb[7].mxu1 }
 0x2e1   :  { %v751_v26 = vpack.c.bf16 %v454_v19, %v453_v21  ;;  %v445_v27 = vadd.f32 %v444_v25, %v348_v23 }
 0x2e2   :  { %v456_v28 = vmax.f32 %v450_v24, 0.0 }
 0x2e3   :  { %v455_v29 = vmax.f32 %v445_v27, 0.0  ;;  %752 = vmatpush3.bf16.msra.mxu1 %v751_v26 }
 0x2e4   :  { %753 = vmatprep.subr.bf16.mxu1 %v788_v11 }
 0x2e5   :  { %v754_v30 = vpack.c.bf16 %v456_v28, %v455_v29 }
 0x2e7   :  { %755 = vmatpush3.bf16.msra.mxu1 %v754_v30 }
 0x2ea   :  { %688 = vmatmul.mubr.msk.f32.vlgmr.msra.gmra.mrb[8].mxu1 %vm355_vm3, %v457_v31 }
 0x3bd   :  { %v537_v37 = vpop.f32.mrb[8].mxu1 }
 0x3be   :  { %v538_v38 = vadd.f32 %v537_v37, %v467_v36  ;;  %v689_v39 = vpop.f32.mrb[9].mxu1 }
 0x3c0   :  { %541 = vst [vmem:[#allocation3] sm:$0x1] %v538_v38 }
 0x3c1   :  { %774 = shalt.err (!%p771_p4)
}
 0x3c2   :  { %s775_s14 = scalar_lea.hbm %s1026_s9, 16 }
 0x3c3   :  { %p776_p5 = scmp.ne.s32.totalorder %s1026_s9, %s775_s14  ;;  %p779_p6 = scmp.lt.u32.totalorder %s775_s14, %s1026_s9 }
 0x3c5   :  { %p781_p7 = pnand %p779_p6, %p776_p5 }
 0x3c7   :  { %784 = shalt.err (!%p781_p7)
}
 0x3c8   :  { %551 = dma.vmem_to_hbm [thread:$0]  %s549_s12, 16, %s1026_s9, [#allocation4]  }
 0x3c9   :  { %785 = dma.done.wait [#allocation4], 16  }
 0x3ca   :  { %786 = vsyncadd [#allocation4], 4294967280 }
 0x3cb   :  { %555 = vsyncpa [#allocation4], 1 }

</bundles_post_ra>
